<compile_context>
chip_gen: v7x
topology: tpu7x:2x2x1
jax: 0.10.0
libtpu: 0.0.40
codegen_flags: <defaults>
</compile_context>

<pallas_src>
import functools

import jax
import jax.numpy as jnp
from jax.experimental import pallas as pl
from jax.experimental.pallas import tpu as pltpu


# --------------------------------------------------------------------------
# Tiled matmul (linear) kernel: y = x @ w [+ b] [fast_gelu] [+ residual]
# --------------------------------------------------------------------------

def _matmul_kernel(*refs, act, has_bias, has_res):
    idx = 0
    x_ref = refs[idx]; idx += 1
    w_ref = refs[idx]; idx += 1
    b_ref = None
    r_ref = None
    if has_bias:
        b_ref = refs[idx]; idx += 1
    if has_res:
        r_ref = refs[idx]; idx += 1
    o_ref = refs[idx]
    acc_ref = refs[idx + 1]

    k = pl.program_id(2)

    @pl.when(k == 0)
    def _():
        acc_ref[...] = jnp.zeros_like(acc_ref)

    # bf16 x bf16 -> fp32 accumulate (native MXU path).
    acc_ref[...] += jnp.dot(x_ref[...], w_ref[...],
                            preferred_element_type=jnp.float32)

    @pl.when(k == pl.num_programs(2) - 1)
    def _():
        y = acc_ref[...]
        if has_bias:
            y = y + b_ref[...].astype(jnp.float32)
        if act == "fast_gelu":
            # torch_npu.fast_gelu(x) == x * sigmoid(1.702 * x)
            y = y * jax.nn.sigmoid(1.702 * y)
        if has_res:
            y = y + r_ref[...].astype(jnp.float32)
        o_ref[...] = y.astype(o_ref.dtype)


def _pick_k_tile(dim, candidates=(1024, 768, 512, 256, 128)):
    """Largest candidate that exactly divides dim (keeps K reduction exact)."""
    for c in candidates:
        if dim >= c and dim % c == 0:
            return c
    return dim


def linear(x, w_t, b=None, *, act="none", residual=None,
           out_dtype=jnp.bfloat16, tm_target=512, tn_target=256):
    """x: (M, K); w_t: pre-transposed (K, Nout) bf16; b: (Nout,) or None.
    Optionally fuses fast_gelu and/or a residual add (residual: (M, Nout))."""
    if x.dtype != w_t.dtype:
        x = x.astype(w_t.dtype)
    M, K = x.shape
    K2, Nout = w_t.shape
    assert K == K2

    tm = M if M <= tm_target else tm_target
    tn = Nout if Nout <= tn_target else tn_target
    tk = _pick_k_tile(K)
    grid = (pl.cdiv(M, tm), pl.cdiv(Nout, tn), pl.cdiv(K, tk))

    in_specs = [
        pl.BlockSpec((tm, tk), lambda i, j, k: (i, k)),
        pl.BlockSpec((tk, tn), lambda i, j, k: (k, j)),
    ]
    args = [x, w_t]
    if b is not None:
        in_specs.append(pl.BlockSpec((1, tn), lambda i, j, k: (0, j)))
        args.append(b.reshape(1, Nout))
    if residual is not None:
        in_specs.append(pl.BlockSpec((tm, tn), lambda i, j, k: (i, j)))
        args.append(residual)

    kernel = functools.partial(_matmul_kernel, act=act,
                               has_bias=b is not None,
                               has_res=residual is not None)
    return pl.pallas_call(
        kernel,
        out_shape=jax.ShapeDtypeStruct((M, Nout), out_dtype),
        grid=grid,
        in_specs=in_specs,
        out_specs=pl.BlockSpec((tm, tn), lambda i, j, k: (i, j)),
        scratch_shapes=[pltpu.VMEM((tm, tn), jnp.float32)],
        compiler_params=pltpu.CompilerParams(
            dimension_semantics=("parallel", "parallel", "arbitrary"),
            vmem_limit_bytes=32 * 1024 * 1024),
    )(*args)


# --------------------------------------------------------------------------
# Row-tiled LayerNorm (fp32 math, bf16 in/out by default)
# --------------------------------------------------------------------------

def _layernorm_kernel(x_ref, g_ref, b_ref, o_ref, *, eps):
    x = x_ref[...].astype(jnp.float32)
    mu = jnp.mean(x, axis=-1, keepdims=True)
    var = jnp.mean(jnp.square(x - mu), axis=-1, keepdims=True)
    xn = (x - mu) * jax.lax.rsqrt(var + eps)
    o_ref[...] = (xn * g_ref[...] + b_ref[...]).astype(o_ref.dtype)


def layernorm(x, g, b, *, eps, out_dtype=jnp.bfloat16, tm_target=1024):
    M, C = x.shape
    tm = M if M <= tm_target else tm_target
    return pl.pallas_call(
        functools.partial(_layernorm_kernel, eps=eps),
        out_shape=jax.ShapeDtypeStruct((M, C), out_dtype),
        grid=(pl.cdiv(M, tm),),
        in_specs=[
            pl.BlockSpec((tm, C), lambda i: (i, 0)),
            pl.BlockSpec((1, C), lambda i: (0, 0)),
            pl.BlockSpec((1, C), lambda i: (0, 0)),
        ],
        out_specs=pl.BlockSpec((tm, C), lambda i: (i, 0)),
        compiler_params=pltpu.CompilerParams(
            dimension_semantics=("parallel",),
            vmem_limit_bytes=32 * 1024 * 1024),
    )(x, g.reshape(1, C), b.reshape(1, C))


# --------------------------------------------------------------------------
# Attention core: grid = (B, H); q/k/v blocks delivered per head via BlockSpec
# --------------------------------------------------------------------------

def _attn_kernel(qkv_ref, o_ref, *, scale):
    qkv = qkv_ref[...]                       # (3, 1, 1, N, hd), bf16
    q = qkv[0, 0, 0] * scale                 # scale folded into q (N*hd mults)
    k = qkv[1, 0, 0]
    v = qkv[2, 0, 0]

    dn = (((1,), (1,)), ((), ()))            # q @ k^T without materialized transpose
    s = jax.lax.dot_general(q, k, dn, preferred_element_type=jnp.float32)
    s = s - jnp.max(s, axis=-1, keepdims=True)
    p = jnp.exp(s)
    p = p * pl.reciprocal(jnp.sum(p, axis=-1, keepdims=True), approx=True)
    out = jnp.dot(p.astype(v.dtype), v, preferred_element_type=jnp.float32)
    o_ref[...] = out[None, None, :, :].astype(o_ref.dtype)


def attention_core(qkv, scale, num_heads):
    """qkv: (B, N, 3C) fused q|k|v  ->  (B, N, C) concatenated head outputs."""
    B, N, C3 = qkv.shape
    C = C3 // 3
    H = num_heads
    hd = C // H
    # Head split / transpose done once in XLA; kernel then reads contiguous
    # (N, hd) blocks per (batch, head) with zero in-kernel lane shuffles.
    qkv_h = qkv.reshape(B, N, 3, H, hd).transpose(2, 0, 3, 1, 4)  # (3, B, H, N, hd)

    out = pl.pallas_call(
        functools.partial(_attn_kernel, scale=scale),
        out_shape=jax.ShapeDtypeStruct((B, H, N, hd), qkv.dtype),
        grid=(B, H),
        in_specs=[pl.BlockSpec((3, 1, 1, N, hd), lambda b, h: (0, b, h, 0, 0))],
        out_specs=pl.BlockSpec((1, 1, N, hd), lambda b, h: (b, h, 0, 0)),
        compiler_params=pltpu.CompilerParams(
            dimension_semantics=("parallel", "parallel")),
    )(qkv_h)
    return out.transpose(0, 2, 1, 3).reshape(B, N, C)


# --------------------------------------------------------------------------
# Model forward
# --------------------------------------------------------------------------

def patch_embed(x, w_t, b, patch_size):
    """Conv2d(kernel=stride=patch_size) as patch-flatten + tiled matmul."""
    B, C, Himg, Wimg = x.shape
    ps = patch_size
    Hp, Wp = Himg // ps, Wimg // ps
    patches = (x.reshape(B, C, Hp, ps, Wp, ps)
                .transpose(0, 2, 4, 1, 3, 5)
                .reshape(B * Hp * Wp, C * ps * ps))
    out = linear(patches, w_t, b)                 # (B*Hp*Wp, embed_dim), bf16
    return out.reshape(B, Hp * Wp, -1)


def block_forward(x_flat, x_shape, p, ln_eps):
    B, N, C = x_shape
    H = p["num_heads"]
    scale = (C // H) ** -0.5

    # --- attention branch ---
    y = layernorm(x_flat, p["ln1_g"], p["ln1_b"], eps=ln_eps)     # bf16
    qkv = linear(y, p["w_qkv"])                                   # (B*N, 3C) bf16, qkv_bias=False
    attn_out = attention_core(qkv.reshape(B, N, 3 * C), scale, H)
    attn_out = attn_out.reshape(B * N, C)
    # proj with fused residual:  x = x + proj(attn_out)
    x_flat = linear(attn_out, p["w_proj"], p["b_proj"], residual=x_flat)

    # --- MLP branch ---
    y = layernorm(x_flat, p["ln2_g"], p["ln2_b"], eps=ln_eps)
    h = linear(y, p["w_fc1"], p["b_fc1"], act="fast_gelu")
    # fc2 with fused residual:  x = x + fc2(h)
    x_flat = linear(h, p["w_fc2"], p["b_fc2"], residual=x_flat)
    return x_flat


def vit_forward(x, params):
    # TODO(synk): interpolate_pos_encoding (bicubic resize) not implemented;
    # assumes input resolution matches the pos_embed grid.
    B = x.shape[0]
    C = params["embed_dim"]
    tok = patch_embed(x, params["patch_wt"], params["patch_b"],
                      params["patch_size"])                        # (B, P, C) bf16
    cls = jnp.broadcast_to(params["cls_token"], (B, 1, C)).astype(tok.dtype)
    tok = jnp.concatenate([cls, tok], axis=1)                      # (B, P+1, C)
    tok = tok + params["pos_embed"].astype(tok.dtype)              # pos_drop identity
    B_, N, _ = tok.shape
    xf = tok.reshape(B_ * N, C)
    for blk in params["blocks"]:
        xf = block_forward(xf, (B_, N, C), blk, params["ln_eps"])
    xf = layernorm(xf, params["norm_g"], params["norm_b"],
                   eps=params["ln_eps"], out_dtype=jnp.float32)
    return xf.reshape(B_, N, C)[:, 0]                              # cls token output


# --------------------------------------------------------------------------
# Deterministic parameter initialization (weights pre-transposed / pre-fused,
# matmul weights stored in bf16; LN params and biases kept fp32)
# --------------------------------------------------------------------------

def init_params(key, *, img_size, patch_size, in_chans, embed_dim, depth,
                num_heads, mlp_ratio):
    num_patches = (img_size // patch_size) ** 2
    hidden = int(embed_dim * mlp_ratio)
    keys = iter(jax.random.split(key, 8 + depth * 8))

    def tn(k, shape, std=0.02):
        return (std * jax.random.truncated_normal(k, -2.0, 2.0, shape)).astype(jnp.float32)

    bf16 = jnp.bfloat16
    patch_w = tn(next(keys), (embed_dim, in_chans, patch_size, patch_size))
    params = {
        "patch_size": patch_size,
        "embed_dim": embed_dim,
        # DINO constructs its ViTs with norm_layer=partial(nn.LayerNorm, eps=1e-6)
        "ln_eps": 1e-6,
        # conv weight flattened + pre-transposed to (C*ps*ps, embed_dim), bf16
        "patch_wt": patch_w.reshape(embed_dim, -1).T.astype(bf16),
        "patch_b": jnp.zeros((embed_dim,), jnp.float32),
        "cls_token": tn(next(keys), (1, 1, embed_dim)).astype(bf16),
        "pos_embed": tn(next(keys), (1, num_patches + 1, embed_dim)).astype(bf16),
        "norm_g": jnp.ones((embed_dim,), jnp.float32),
        "norm_b": jnp.zeros((embed_dim,), jnp.float32),
        "blocks": [],
    }
    for _ in range(depth):
        wq = tn(next(keys), (embed_dim, embed_dim))      # torch layout (out, in)
        wk = tn(next(keys), (embed_dim, embed_dim))
        wv = tn(next(keys), (embed_dim, embed_dim))
        wproj = tn(next(keys), (embed_dim, embed_dim))
        wfc1 = tn(next(keys), (hidden, embed_dim))
        wfc2 = tn(next(keys), (embed_dim, hidden))
        params["blocks"].append({
            "num_heads": num_heads,
            "ln1_g": jnp.ones((embed_dim,), jnp.float32),
            "ln1_b": jnp.zeros((embed_dim,), jnp.float32),
            # pre-transposed, Q|K|V fused along the output dim: (C, 3C), bf16
            "w_qkv": jnp.concatenate([wq.T, wk.T, wv.T], axis=1).astype(bf16),
            "w_proj": wproj.T.astype(bf16),              # (C, C)
            "b_proj": jnp.zeros((embed_dim,), jnp.float32),
            "ln2_g": jnp.ones((embed_dim,), jnp.float32),
            "ln2_b": jnp.zeros((embed_dim,), jnp.float32),
            "w_fc1": wfc1.T.astype(bf16),                # (C, hidden)
            "b_fc1": jnp.zeros((hidden,), jnp.float32),
            "w_fc2": wfc2.T.astype(bf16),                # (hidden, C)
            "b_fc2": jnp.zeros((embed_dim,), jnp.float32),
        })
    return params


# --------------------------------------------------------------------------

if __name__ == "__main__":
    # Small config: img 16x16, patch 8 -> 4 patches + cls = 5 tokens, dim 32.
    cfg = dict(img_size=16, patch_size=8, in_chans=3, embed_dim=32,
               depth=2, num_heads=4, mlp_ratio=4.0)

    key = jax.random.PRNGKey(0)
    k_params, k_x = jax.random.split(key)
    params = init_params(k_params, **cfg)

    x = jax.random.normal(
        k_x, (2, cfg["in_chans"], cfg["img_size"], cfg["img_size"]), jnp.float32)

    out = vit_forward(x, params)           # (B, embed_dim) = (2, 32)
    jax.block_until_ready(out)
    assert out.shape == (2, cfg["embed_dim"])
    assert bool(jnp.all(jnp.isfinite(out)))
    print("KERNEL_OK")
</pallas_src>

<mosaic_0001>
module attributes {stable_mosaic.version = 11 : i64} {
  func.func @_matmul_kernel(%arg0: i32, %arg1: i32, %arg2: i32, %arg3: memref<8x192xbf16, #tpu.memory_space<vmem>>, %arg4: memref<192x32xbf16, #tpu.memory_space<vmem>>, %arg5: memref<1x32xf32, #tpu.memory_space<vmem>>, %arg6: memref<8x32xbf16, #tpu.memory_space<vmem>>, %arg7: memref<8x32xf32, #tpu.memory_space<vmem>>) attributes {dimension_semantics = [#tpu.dimension_semantics<parallel>, #tpu.dimension_semantics<parallel>, #tpu.dimension_semantics<arbitrary>], iteration_bounds = array<i64: 1, 1, 1>, scalar_prefetch = 0 : i64, scratch_operands = 1 : i64, tpu.core_type = #tpu.core_type<tc>, window_params = [{transform_indices = @transform_0, window_bounds = array<i64: 8, 192>}, {transform_indices = @transform_1, window_bounds = array<i64: 192, 32>}, {transform_indices = @transform_2, window_bounds = array<i64: 1, 32>}, {transform_indices = @transform_3, window_bounds = array<i64: 8, 32>}]} {
    %c0_i32 = arith.constant 0 : i32
    %0 = arith.cmpi eq, %arg2, %c0_i32 : i32
    %1 = arith.extui %0 : i1 to i32
    %c0_i32_0 = arith.constant 0 : i32
    %2 = arith.cmpi ne, %1, %c0_i32_0 : i32
    scf.if %2 {
      %cst_10 = arith.constant 0.000000e+00 : f32
      %12 = vector.broadcast %cst_10 : f32 to vector<8x32xf32>
      %c0_11 = arith.constant 0 : index
      %c0_12 = arith.constant 0 : index
      %13 = vector.load %arg7[%c0_11, %c0_12] : memref<8x32xf32, #tpu.memory_space<vmem>>, vector<8x32xf32>
      tpu.vector_store %arg7[%c0_11, %c0_12], %12 {strides = array<i32>} : memref<8x32xf32, #tpu.memory_space<vmem>>, vector<8x32xf32>,
    } else {
    }
    %c0 = arith.constant 0 : index
    %c0_1 = arith.constant 0 : index
    %3 = vector.load %arg7[%c0, %c0_1] : memref<8x32xf32, #tpu.memory_space<vmem>>, vector<8x32xf32>
    %c0_2 = arith.constant 0 : index
    %c0_3 = arith.constant 0 : index
    %4 = vector.load %arg3[%c0_2, %c0_3] : memref<8x192xbf16, #tpu.memory_space<vmem>>, vector<8x192xbf16>
    %c0_4 = arith.constant 0 : index
    %c0_5 = arith.constant 0 : index
    %5 = vector.load %arg4[%c0_4, %c0_5] : memref<192x32xbf16, #tpu.memory_space<vmem>>, vector<192x32xbf16>
    %cst = arith.constant dense<0.000000e+00> : vector<8x32xf32>
    %6 = tpu.matmul %4, %5, %cst {dimension_numbers = #tpu.dot_dimension_numbers<[1], [0], [0], [1], [0, 0, 1, 1], [], []>} : vector<8x192xbf16>, vector<192x32xbf16>, vector<8x32xf32> -> vector<8x32xf32>
    %7 = arith.addf %3, %6 : vector<8x32xf32>
    %c0_6 = arith.constant 0 : index
    %c0_7 = arith.constant 0 : index
    %8 = vector.load %arg7[%c0_6, %c0_7] : memref<8x32xf32, #tpu.memory_space<vmem>>, vector<8x32xf32>
    tpu.vector_store %arg7[%c0_6, %c0_7], %7 {strides = array<i32>} : memref<8x32xf32, #tpu.memory_space<vmem>>, vector<8x32xf32>,
    %c0_i32_8 = arith.constant 0 : i32
    %9 = arith.cmpi eq, %arg2, %c0_i32_8 : i32
    %10 = arith.extui %9 : i1 to i32
    %c0_i32_9 = arith.constant 0 : i32
    %11 = arith.cmpi ne, %10, %c0_i32_9 : i32
    scf.if %11 {
      %c0_10 = arith.constant 0 : index
      %c0_11 = arith.constant 0 : index
      %12 = vector.load %arg7[%c0_10, %c0_11] : memref<8x32xf32, #tpu.memory_space<vmem>>, vector<8x32xf32>
      %c0_12 = arith.constant 0 : index
      %c0_13 = arith.constant 0 : index
      %13 = vector.load %arg5[%c0_12, %c0_13] : memref<1x32xf32, #tpu.memory_space<vmem>>, vector<1x32xf32>
      %14 = vector.broadcast %13 : vector<1x32xf32> to vector<8x32xf32>
      %15 = arith.addf %12, %14 : vector<8x32xf32>
      %16 = arith.truncf %15 : vector<8x32xf32> to vector<8x32xbf16>
      %c0_14 = arith.constant 0 : index
      %c0_15 = arith.constant 0 : index
      %17 = vector.load %arg6[%c0_14, %c0_15] : memref<8x32xbf16, #tpu.memory_space<vmem>>, vector<8x32xbf16>
      tpu.vector_store %arg6[%c0_14, %c0_15], %16 {strides = array<i32>} : memref<8x32xbf16, #tpu.memory_space<vmem>>, vector<8x32xbf16>,
    } else {
    }
    return
  }
  func.func @transform_0(%arg0: i32, %arg1: i32, %arg2: i32) -> (i32, i32) {
    %c0_i32 = arith.constant 0 : i32
    return %arg0, %arg2 : i32, i32
  }
  func.func @transform_1(%arg0: i32, %arg1: i32, %arg2: i32) -> (i32, i32) {
    %c0_i32 = arith.constant 0 : i32
    return %arg2, %arg1 : i32, i32
  }
  func.func @transform_2(%arg0: i32, %arg1: i32, %arg2: i32) -> (i32, i32) {
    %c0_i32 = arith.constant 0 : i32
    %c0_i32_0 = arith.constant 0 : i32
    return %c0_i32, %arg1 : i32, i32
  }
  func.func @transform_3(%arg0: i32, %arg1: i32, %arg2: i32) -> (i32, i32) {
    %c0_i32 = arith.constant 0 : i32
    return %arg0, %arg1 : i32, i32
  }
}

</mosaic_0001>

<bundles_post_ra>
// kernel: tpu_custom_call.1
= control target key start
LH: loop header
LB: loop body
LE: loop exit
PB: predicated region body
PF: predicated region fallthrough
CT: control target
= control target key end

     0   :  { %v259_v1 = vmov 0   ;;  %vm20_vm0 = vcmask 261120   ;;  %v260_v3 = vmov 0.0   ;;  %vm126_vm1 = vcmask 523264   ;;  %s338_s0 = inlined_call_operand.vmem [shape: bf16[8,192], index: 0, kind: input, shape index: {}]   ;;  %s339_s1 = inlined_call_operand.vmem [shape: bf16[192,32], index: 1, kind: input, shape index: {}]   ;;  %s340_s2 = inlined_call_operand.vmem [shape: f32[1,32], index: 2, kind: input, shape index: {}]   ;;  %s341_s3 = inlined_call_operand.hbm [shape: bf16[8,32], index: 3, kind: output, shape index: {}]  }
   0x1   :  { %v221_v0 = vld [vmem:[%s339_s1] sm:$0xff]   ;;  %130 = vmatprep.subr.bf16.mxu0 %v259_v1  ;;  %v222_v2 = vld [vmem:[%s339_s1 + $0x8] sm:$0xff]   ;;  %21 = vst.msk [vmem:[#allocation2] sm:$0xff] %vm20_vm0, %v260_v3  ;;  %v223_v4 = vld [vmem:[%s339_s1 + $0x10] sm:$0xff]  }
   0x2   :  { %131 = vmatpush1.bf16.msra.mxu0 %v221_v0  ;;  %v224_v5 = vld [vmem:[%s339_s1 + $0x18] sm:$0xff]   ;;  %v23_v6 = vld [vmem:[%s338_s0] sm:$0xff] }
   0x3   :  { %132 = vmatprep.subr.bf16.mxu0 %v259_v1 }
   0x6   :  { %133 = vmatpush1.bf16.msra.mxu0 %v222_v2 }
   0x7   :  { %134 = vmatprep.subr.bf16.mxu0 %v259_v1 }
   0xa   :  { %135 = vmatpush1.bf16.msra.mxu0 %v223_v4 }
   0xb   :  { %136 = vmatprep.subr.bf16.mxu0 %v259_v1 }
   0xc   :  { %8 = vsyncpa [#allocation4], 0  ;;  %v203_v7 = vcombine.high %v23_v6, %v23_v6  ;;  %v225_v8 = vld [vmem:[%s339_s1 + $0x20] sm:$0xff]   ;;  %v226_v9 = vld [vmem:[%s339_s1 + $0x28] sm:$0xff]   ;;  %v202_v16 = vcombine.low %v23_v6, %v23_v6  ;;  %s261_s12 = smov [#allocation3]   ;;  %vm186_vm2 = vcmask 257024  }
   0xd   :  { %v227_v10 = vld [vmem:[%s339_s1 + $0x30] sm:$0xff]   ;;  %v228_v11 = vld [vmem:[%s339_s1 + $0x38] sm:$0xff]   ;;  %v229_v12 = vld [vmem:[%s339_s1 + $0x40] sm:$0xff]   ;;  %s194_s13 = sshll.u32 %s261_s12, 4  ;;  %s195_s13 = int_to_ptr.vmem [resolvable:$true] %s194_s13 }
   0xe   :  { %137 = vmatpush1.bf16.msra.mxu0 %v224_v5  ;;  %216 = vmatprep.mubr.msk.bf16.mxu0 %vm126_vm1, %v203_v7  ;;  %v230_v13 = vld [vmem:[%s339_s1 + $0x48] sm:$0xff]   ;;  %v231_v14 = vld [vmem:[%s339_s1 + $0x50] sm:$0xff]   ;;  %v232_v15 = vld [vmem:[%s339_s1 + $0x58] sm:$0xff]   ;;  %s235_s1 = scalar_lea.vmem %s195_s13, 64  ;;  %p240_p1 = scmp.lt.s32.totalorder %s195_s13, %s195_s13 }
   0xf   :  { %138 = vmatprep.subr.bf16.mxu0 %v259_v1  ;;  %v22_v17 = vld [vmem:[#allocation2] sm:$0xff]  ;;  %p236_p0 = scmp.ne.s32.totalorder %s195_s13, %s235_s1  ;;  %p241_p2 = scmp.lt.s32.totalorder %s235_s1, %s235_s1 }
  0x10   :  { %v217_v23 = vld [vmem:[%s340_s2] ss:$0 sm:$0xff] }
  0x11   :  { %p242_p3 = por %p241_p2, %p240_p1 }
  0x12   :  { %139 = vmatpush1.bf16.msra.mxu0 %v225_v8 }
  0x13   :  { %140 = vmatprep.subr.bf16.mxu0 %v259_v1  ;;  %p243_p4 = pnand %p242_p3, %p236_p0 }
  0x16   :  { %141 = vmatpush1.bf16.msra.mxu0 %v226_v9 }
  0x17   :  { %142 = vmatprep.subr.bf16.mxu0 %v259_v1 }
  0x1a   :  { %143 = vmatpush1.bf16.msra.mxu0 %v227_v10 }
  0x1b   :  { %144 = vmatprep.subr.bf16.mxu0 %v259_v1 }
  0x1e   :  { %145 = vmatpush1.bf16.msra.mxu0 %v228_v11 }
  0x1f   :  { %146 = vmatprep.subr.bf16.mxu0 %v259_v1 }
  0x22   :  { %147 = vmatpush1.bf16.msra.mxu0 %v229_v12 }
  0x23   :  { %148 = vmatprep.subr.bf16.mxu0 %v259_v1 }
  0x26   :  { %149 = vmatpush1.bf16.msra.mxu0 %v230_v13 }
  0x27   :  { %150 = vmatprep.subr.bf16.mxu0 %v259_v1 }
  0x2a   :  { %151 = vmatpush1.bf16.msra.mxu0 %v231_v14 }
  0x2b   :  { %152 = vmatprep.subr.bf16.mxu0 %v259_v1 }
  0x2e   :  { %153 = vmatpush1.bf16.msra.mxu0 %v232_v15 }
  0x31   :  { %163 = vmatmul.mubr.bf16.vlgmr.msra.gmra.mrb[0].mxu0 %v202_v16 }
 0x104   :  { %v164_v18 = vpop.f32.mrb[0].mxu0 }
 0x105   :  { %v170_v19 = vadd.f32 %v164_v18, %v22_v17  ;;  %v166_v20 = vpop.f32.mrb[1].mxu0 }
 0x106   :  { %v167_v21 = vpop.f32.mrb[2].mxu0 }
 0x107   :  { %172 = vst.msk [vmem:[#allocation2] sm:$0xff] %vm20_vm0, %v170_v19  ;;  %v168_v22 = vpop.f32.mrb[3].mxu0 }
 0x10e   :  { %v176_v24 = vld [vmem:[#allocation2] sm:$0xff] }
 0x10f   :  { %v184_v25 = vadd.f32 %v217_v23, %v176_v24 }
 0x111   :  { %v185_v26 = vpack.c.bf16 %v184_v25, %v184_v25 }
 0x113   :  { %187 = vst.msk [vmem:[#allocation3] sm:$0xf] %vm186_vm2, %v185_v26 }
 0x114   :  { %246 = shalt.err (!%p243_p4)
}
 0x115   :  { %s247_s16 = scalar_lea.hbm %s341_s3, 64 }
 0x116   :  { %p248_p5 = scmp.ne.s32.totalorder %s341_s3, %s247_s16  ;;  %p251_p6 = scmp.lt.u32.totalorder %s247_s16, %s341_s3 }
 0x118   :  { %p253_p7 = pnand %p251_p6, %p248_p5 }
 0x11a   :  { %256 = shalt.err (!%p253_p7)
}
 0x11b   :  { %197 = dma.vmem_to_hbm [thread:$0]  %s195_s13, 64, %s341_s3, [#allocation4]  }
 0x11c   :  { %257 = dma.done.wait [#allocation4], 64  }
 0x11d   :  { %258 = vsyncadd [#allocation4], 4294967232 }
 0x11e   :  { %201 = vsyncpa [#allocation4], 1 }

</bundles_post_ra>
